<compile_context>
chip_gen: v7x
topology: tpu7x:2x2x1
jax: 0.10.0
libtpu: 0.0.40
codegen_flags: <defaults>
</compile_context>

<pallas_src>
import functools

import jax
import jax.numpy as jnp
from jax.experimental import pallas as pl
from jax.experimental.pallas import tpu as pltpu

_LANES = 128


def _cdiv(a, b):
    return -(-a // b)


def _combo_sums_kernel(p_ref, t_ref, sq_ref, nll_ref, acc_sq, acc_nll, *,
                       tile_rows, blocks_per_slice, n_valid, needs_mask,
                       is_modeling_inverse, approx_reciprocal):
    """Accumulates per-slice partial sums of squared error and NLL terms."""
    s = pl.program_id(0)  # parallel slice (megacore)
    i = pl.program_id(1)  # reduction step within the slice

    @pl.when(i == 0)
    def _():
        acc_sq[...] = jnp.zeros_like(acc_sq)
        acc_nll[...] = jnp.zeros_like(acc_nll)

    p = p_ref[...].astype(jnp.float32)
    t = t_ref[...].astype(jnp.float32)

    if not is_modeling_inverse:
        # MSE term: (p - t)^2 ; NLL term: t/p + log(p)
        diff = p - t
        nll = t * pl.reciprocal(p, approx=approx_reciprocal) + jnp.log(p)
    else:
        # MSE term: (1/p - t)^2 ; NLL term: t*p - log(p)
        diff = pl.reciprocal(p, approx=approx_reciprocal) - t
        nll = t * p - jnp.log(p)

    sq = diff * diff

    if needs_mask:
        # Zero out contributions from padded tail elements (flat index >= n_valid).
        # NOTE: int32 flat index; fine for loss tensors well below 2^31 elements.
        block = s * blocks_per_slice + i
        base = block * (tile_rows * _LANES)
        row = jax.lax.broadcasted_iota(jnp.int32, (tile_rows, _LANES), 0)
        lane = jax.lax.broadcasted_iota(jnp.int32, (tile_rows, _LANES), 1)
        valid = (base + row * _LANES + lane) < n_valid
        sq = jnp.where(valid, sq, 0.0)
        nll = jnp.where(valid, nll, 0.0)

    # Vreg-shaped accumulation: reduce (tile_rows,128) -> (8,128) with pure VPU adds.
    acc_sq[...] += jnp.sum(sq.reshape(tile_rows // 8, 8, _LANES), axis=0)
    acc_nll[...] += jnp.sum(nll.reshape(tile_rows // 8, 8, _LANES), axis=0)

    @pl.when(i == pl.num_programs(1) - 1)
    def _():
        sq_ref[...] = acc_sq[...]
        nll_ref[...] = acc_nll[...]


def _combo_sums(preds2d, targets2d, *, tile_rows, num_slices, n_valid,
                is_modeling_inverse, approx_reciprocal):
    R, C = preds2d.shape
    nb = R // tile_rows
    bps = nb // num_slices
    needs_mask = (R * C) != n_valid

    kernel = functools.partial(
        _combo_sums_kernel,
        tile_rows=tile_rows, blocks_per_slice=bps, n_valid=n_valid,
        needs_mask=needs_mask, is_modeling_inverse=is_modeling_inverse,
        approx_reciprocal=approx_reciprocal)

    in_spec = pl.BlockSpec((tile_rows, C), lambda s, i: (s * bps + i, 0))
    out_spec = pl.BlockSpec((8, _LANES), lambda s, i: (s, 0))

    sq_part, nll_part = pl.pallas_call(
        kernel,
        out_shape=(jax.ShapeDtypeStruct((num_slices * 8, _LANES), jnp.float32),
                   jax.ShapeDtypeStruct((num_slices * 8, _LANES), jnp.float32)),
        grid_spec=pltpu.PrefetchScalarGridSpec(
            num_scalar_prefetch=0,
            grid=(num_slices, bps),
            in_specs=[in_spec, in_spec],
            out_specs=[out_spec, out_spec],
            scratch_shapes=[pltpu.VMEM((8, _LANES), jnp.float32),
                            pltpu.VMEM((8, _LANES), jnp.float32)],
        ),
        compiler_params=pltpu.CompilerParams(
            dimension_semantics=("parallel", "arbitrary")),
    )(preds2d, targets2d)

    return jnp.sum(sq_part), jnp.sum(nll_part)


def static_combo_log_mse_loss(preds, targets, *, is_modeling_inverse=False,
                              w_MSE=None, w_NLL=None, w_min=0.05,
                              tile_rows=1024, approx_reciprocal=False):
    """JAX/Pallas equivalent of StaticComboLogMSELoss.forward (returns scalar loss)."""
    if (w_MSE is None) != (w_NLL is None):
        raise ValueError("Provide both w_MSE and w_NLL, or neither.")

    n = preds.size
    # Keep native dtype on the way into the kernel (cast happens per-tile on the VPU).
    p_flat = jnp.ravel(preds)
    t_flat = jnp.ravel(targets)

    # Sublane alignment depends on packing: f32 -> 8, bf16 -> 16, int8/fp8 -> 32.
    itemsize = min(jnp.dtype(p_flat.dtype).itemsize, jnp.dtype(t_flat.dtype).itemsize)
    sub = 8 * max(1, 4 // max(1, itemsize))

    rows = _cdiv(n, _LANES)
    rows_a = _cdiv(rows, sub) * sub
    cap = max(sub, (min(tile_rows, rows_a) // sub) * sub)   # keep blocks <= ~0.5 MiB/f32
    nb = _cdiv(rows_a, cap)
    eff_tile = _cdiv(_cdiv(rows_a, nb), sub) * sub          # balanced tile, multiple of `sub`
    R = nb * eff_tile

    pad = R * _LANES - n
    if pad:
        # preds padded with 1.0 (safe for log / reciprocal); tail is masked in-kernel.
        p_flat = jnp.concatenate([p_flat, jnp.ones((pad,), p_flat.dtype)])
        t_flat = jnp.concatenate([t_flat, jnp.zeros((pad,), t_flat.dtype)])

    preds2d = p_flat.reshape(R, _LANES)
    targets2d = t_flat.reshape(R, _LANES)

    # Split the row range across 2 TensorCores on v7x; harmless size-1 axis otherwise.
    num_slices = 2 if (nb >= 2 and nb % 2 == 0) else 1

    sq_sum, nll_sum = _combo_sums(
        preds2d, targets2d, tile_rows=eff_tile, num_slices=num_slices,
        n_valid=n, is_modeling_inverse=is_modeling_inverse,
        approx_reciprocal=approx_reciprocal)

    mse = sq_sum / n
    loss_from_mse = jnp.log1p(mse)      # log(1 + mse), numerically safer
    loss_from_nll = nll_sum / n

    if w_MSE is None:
        # Dynamic weighting (data-dependent branch of the PyTorch module), done with
        # jnp.where on scalars.  Normalizer is unguarded, matching the original.
        normalizer = loss_from_mse + loss_from_nll
        wM = loss_from_nll / normalizer
        wN = loss_from_mse / normalizer
        wM_a = jnp.maximum(jnp.float32(w_min), wM)   # branch: w_MSE <= w_NLL
        wN_a = 1.0 - wM_a
        wN_b = jnp.maximum(jnp.float32(w_min), wN)   # branch: w_MSE > w_NLL
        wM_b = 1.0 - wN_b
        cond = wM <= wN
        wM = jnp.where(cond, wM_a, wM_b)
        wN = jnp.where(cond, wN_a, wN_b)
    else:
        wM = jnp.float32(w_MSE)
        wN = jnp.float32(w_NLL)

    # TODO(synk): the PyTorch module caches the dynamic weights via setattr on the
    # module (host-side .detach().cpu()); there is no module state here.
    return wM * loss_from_mse + wN * loss_from_nll


def _reference_loss(preds, targets, *, is_modeling_inverse=False,
                    w_MSE=None, w_NLL=None, w_min=0.05):
    """Pure-JAX reference of the same forward."""
    p = preds.astype(jnp.float32)
    t = targets.astype(jnp.float32)
    if not is_modeling_inverse:
        loss_mse = jnp.log1p(jnp.mean((p - t) ** 2))
        loss_nll = jnp.mean(t / p + jnp.log(p))
    else:
        loss_mse = jnp.log1p(jnp.mean((1.0 / p - t) ** 2))
        loss_nll = jnp.mean(t * p - jnp.log(p))
    if w_MSE is None and w_NLL is None:
        norm = loss_mse + loss_nll
        wM, wN = float(loss_nll / norm), float(loss_mse / norm)
        if wM <= wN:
            wM = max(w_min, wM); wN = 1 - wM
        else:
            wN = max(w_min, wN); wM = 1 - wN
    else:
        wM, wN = w_MSE, w_NLL
    return wM * loss_mse + wN * loss_nll


if __name__ == "__main__":
    key = jax.random.PRNGKey(0)
    k1, k2, k3, k4 = jax.random.split(key, 4)

    # Test 1: NCHW per-pixel variance head (2, 4, 16, 16), dynamic weights.
    B, C, H, W = 2, 4, 16, 16
    preds = jnp.exp(0.3 * jax.random.normal(k1, (B, C, H, W), dtype=jnp.float32))
    targets = jax.random.normal(k2, (B, C, H, W), dtype=jnp.float32) ** 2

    loss = jax.block_until_ready(static_combo_log_mse_loss(preds, targets))
    ref = _reference_loss(preds, targets)
    assert jnp.allclose(loss, ref, rtol=1e-5, atol=1e-6), (loss, ref)

    # Test 2: non tile-aligned shape + inverse modeling + static weights (exercises
    # the padded/masked remainder path).
    preds2 = jnp.exp(0.3 * jax.random.normal(k3, (2, 3, 15, 17), dtype=jnp.float32))
    targets2 = jax.random.normal(k4, (2, 3, 15, 17), dtype=jnp.float32) ** 2
    loss2 = jax.block_until_ready(
        static_combo_log_mse_loss(preds2, targets2, is_modeling_inverse=True,
                                  w_MSE=0.3, w_NLL=0.7))
    ref2 = _reference_loss(preds2, targets2, is_modeling_inverse=True,
                           w_MSE=0.3, w_NLL=0.7)
    assert jnp.allclose(loss2, ref2, rtol=1e-5, atol=1e-6), (loss2, ref2)

    print("KERNEL_OK")
</pallas_src>

<mosaic_0001>
module attributes {stable_mosaic.version = 11 : i64} {
  func.func @_combo_sums_kernel(%arg0: i32, %arg1: i32, %arg2: memref<16x128xf32, #tpu.memory_space<vmem>>, %arg3: memref<16x128xf32, #tpu.memory_space<vmem>>, %arg4: memref<8x128xf32, #tpu.memory_space<vmem>>, %arg5: memref<8x128xf32, #tpu.memory_space<vmem>>, %arg6: memref<8x128xf32, #tpu.memory_space<vmem>>, %arg7: memref<8x128xf32, #tpu.memory_space<vmem>>) attributes {dimension_semantics = [#tpu.dimension_semantics<parallel>, #tpu.dimension_semantics<arbitrary>], iteration_bounds = array<i64: 1, 1>, scalar_prefetch = 0 : i64, scratch_operands = 2 : i64, tpu.core_type = #tpu.core_type<tc>, window_params = [{transform_indices = @transform_0, window_bounds = array<i64: 16, 128>}, {transform_indices = @transform_1, window_bounds = array<i64: 16, 128>}, {transform_indices = @transform_2, window_bounds = array<i64: 8, 128>}, {transform_indices = @transform_3, window_bounds = array<i64: 8, 128>}]} {
    %c0_i32 = arith.constant 0 : i32
    %0 = arith.cmpi eq, %arg1, %c0_i32 : i32
    %1 = arith.extui %0 : i1 to i32
    %c0_i32_0 = arith.constant 0 : i32
    %2 = arith.cmpi ne, %1, %c0_i32_0 : i32
    scf.if %2 {
      %cst_15 = arith.constant 0.000000e+00 : f32
      %24 = vector.broadcast %cst_15 : f32 to vector<8x128xf32>
      %c0_16 = arith.constant 0 : index
      %c0_17 = arith.constant 0 : index
      %25 = vector.load %arg6[%c0_16, %c0_17] : memref<8x128xf32, #tpu.memory_space<vmem>>, vector<8x128xf32>
      tpu.vector_store %arg6[%c0_16, %c0_17], %24 {strides = array<i32>} : memref<8x128xf32, #tpu.memory_space<vmem>>, vector<8x128xf32>,
      %cst_18 = arith.constant 0.000000e+00 : f32
      %26 = vector.broadcast %cst_18 : f32 to vector<8x128xf32>
      %c0_19 = arith.constant 0 : index
      %c0_20 = arith.constant 0 : index
      %27 = vector.load %arg7[%c0_19, %c0_20] : memref<8x128xf32, #tpu.memory_space<vmem>>, vector<8x128xf32>
      tpu.vector_store %arg7[%c0_19, %c0_20], %26 {strides = array<i32>} : memref<8x128xf32, #tpu.memory_space<vmem>>, vector<8x128xf32>,
    } else {
    }
    %c0 = arith.constant 0 : index
    %c0_1 = arith.constant 0 : index
    %3 = vector.load %arg2[%c0, %c0_1] : memref<16x128xf32, #tpu.memory_space<vmem>>, vector<16x128xf32>
    %c0_2 = arith.constant 0 : index
    %c0_3 = arith.constant 0 : index
    %4 = vector.load %arg3[%c0_2, %c0_3] : memref<16x128xf32, #tpu.memory_space<vmem>>, vector<16x128xf32>
    %5 = arith.subf %3, %4 : vector<16x128xf32>
    %6 = tpu.reciprocal %3 : vector<16x128xf32> -> vector<16x128xf32>
    %7 = arith.mulf %4, %6 : vector<16x128xf32>
    %8 = math.log %3 : vector<16x128xf32>
    %9 = arith.addf %7, %8 : vector<16x128xf32>
    %10 = arith.mulf %5, %5 : vector<16x128xf32>
    %c0_4 = arith.constant 0 : index
    %c0_5 = arith.constant 0 : index
    %11 = vector.load %arg6[%c0_4, %c0_5] : memref<8x128xf32, #tpu.memory_space<vmem>>, vector<8x128xf32>
    %12 = vector.shape_cast %10 : vector<16x128xf32> to vector<2x8x128xf32>
    %cst = arith.constant dense<0.000000e+00> : vector<8x128xf32>
    %13 = vector.multi_reduction <add>, %12, %cst [0] : vector<2x8x128xf32> to vector<8x128xf32>
    %14 = arith.addf %11, %13 : vector<8x128xf32>
    %c0_6 = arith.constant 0 : index
    %c0_7 = arith.constant 0 : index
    %15 = vector.load %arg6[%c0_6, %c0_7] : memref<8x128xf32, #tpu.memory_space<vmem>>, vector<8x128xf32>
    tpu.vector_store %arg6[%c0_6, %c0_7], %14 {strides = array<i32>} : memref<8x128xf32, #tpu.memory_space<vmem>>, vector<8x128xf32>,
    %c0_8 = arith.constant 0 : index
    %c0_9 = arith.constant 0 : index
    %16 = vector.load %arg7[%c0_8, %c0_9] : memref<8x128xf32, #tpu.memory_space<vmem>>, vector<8x128xf32>
    %17 = vector.shape_cast %9 : vector<16x128xf32> to vector<2x8x128xf32>
    %cst_10 = arith.constant dense<0.000000e+00> : vector<8x128xf32>
    %18 = vector.multi_reduction <add>, %17, %cst_10 [0] : vector<2x8x128xf32> to vector<8x128xf32>
    %19 = arith.addf %16, %18 : vector<8x128xf32>
    %c0_11 = arith.constant 0 : index
    %c0_12 = arith.constant 0 : index
    %20 = vector.load %arg7[%c0_11, %c0_12] : memref<8x128xf32, #tpu.memory_space<vmem>>, vector<8x128xf32>
    tpu.vector_store %arg7[%c0_11, %c0_12], %19 {strides = array<i32>} : memref<8x128xf32, #tpu.memory_space<vmem>>, vector<8x128xf32>,
    %c0_i32_13 = arith.constant 0 : i32
    %21 = arith.cmpi eq, %arg1, %c0_i32_13 : i32
    %22 = arith.extui %21 : i1 to i32
    %c0_i32_14 = arith.constant 0 : i32
    %23 = arith.cmpi ne, %22, %c0_i32_14 : i32
    scf.if %23 {
      %c0_15 = arith.constant 0 : index
      %c0_16 = arith.constant 0 : index
      %24 = vector.load %arg6[%c0_15, %c0_16] : memref<8x128xf32, #tpu.memory_space<vmem>>, vector<8x128xf32>
      %c0_17 = arith.constant 0 : index
      %c0_18 = arith.constant 0 : index
      %25 = vector.load %arg4[%c0_17, %c0_18] : memref<8x128xf32, #tpu.memory_space<vmem>>, vector<8x128xf32>
      tpu.vector_store %arg4[%c0_17, %c0_18], %24 {strides = array<i32>} : memref<8x128xf32, #tpu.memory_space<vmem>>, vector<8x128xf32>,
      %c0_19 = arith.constant 0 : index
      %c0_20 = arith.constant 0 : index
      %26 = vector.load %arg7[%c0_19, %c0_20] : memref<8x128xf32, #tpu.memory_space<vmem>>, vector<8x128xf32>
      %c0_21 = arith.constant 0 : index
      %c0_22 = arith.constant 0 : index
      %27 = vector.load %arg5[%c0_21, %c0_22] : memref<8x128xf32, #tpu.memory_space<vmem>>, vector<8x128xf32>
      tpu.vector_store %arg5[%c0_21, %c0_22], %26 {strides = array<i32>} : memref<8x128xf32, #tpu.memory_space<vmem>>, vector<8x128xf32>,
    } else {
    }
    return
  }
  func.func @transform_0(%arg0: i32, %arg1: i32) -> (i32, i32) {
    %c1_i32 = arith.constant 1 : i32
    %0 = arith.muli %arg0, %c1_i32 : i32
    %1 = arith.addi %0, %arg1 : i32
    %c0_i32 = arith.constant 0 : i32
    %c0_i32_0 = arith.constant 0 : i32
    return %1, %c0_i32 : i32, i32
  }
  func.func @transform_1(%arg0: i32, %arg1: i32) -> (i32, i32) {
    %c1_i32 = arith.constant 1 : i32
    %0 = arith.muli %arg0, %c1_i32 : i32
    %1 = arith.addi %0, %arg1 : i32
    %c0_i32 = arith.constant 0 : i32
    %c0_i32_0 = arith.constant 0 : i32
    return %1, %c0_i32 : i32, i32
  }
  func.func @transform_2(%arg0: i32, %arg1: i32) -> (i32, i32) {
    %c0_i32 = arith.constant 0 : i32
    %c0_i32_0 = arith.constant 0 : i32
    return %arg0, %c0_i32 : i32, i32
  }
  func.func @transform_3(%arg0: i32, %arg1: i32) -> (i32, i32) {
    %c0_i32 = arith.constant 0 : i32
    %c0_i32_0 = arith.constant 0 : i32
    return %arg0, %c0_i32 : i32, i32
  }
}

</mosaic_0001>

<bundles_post_ra>
// kernel: tpu_custom_call.1
= control target key start
LH: loop header
LB: loop body
LE: loop exit
PB: predicated region body
PF: predicated region fallthrough
CT: control target
= control target key end

     0   :  { %9 = vsyncpa [#allocation5], 0  ;;  %s308_s0 = inlined_call_operand.hbm [shape: f32[16,128], index: 0, kind: input, shape index: {}]   ;;  %s309_s1 = inlined_call_operand.hbm [shape: f32[16,128], index: 1, kind: input, shape index: {}]   ;;  %s310_s2 = inlined_call_operand.hbm [shape: f32[8,128], index: 2, kind: output, shape index: {0}]   ;;  %s311_s3 = inlined_call_operand.hbm [shape: f32[8,128], index: 3, kind: output, shape index: {1}]  }
   0x1   :  { %10 = vsyncpa [#allocation8], 0 }
   0x2   :  { %11 = vsyncpa [#allocation6], 0 }
   0x3   :  { %12 = vsyncpa [#allocation11], 0  ;;  %s234_s12 = smov [#allocation4]   ;;  %s138_s16 = scalar_lea.hbm %s308_s0, 256 }
   0x4   :  { %s22_s13 = sshll.u32 %s234_s12, 4  ;;  %p139_p0 = scmp.ne.s32.totalorder %s308_s0, %s138_s16  ;;  %s23_s13 = int_to_ptr.vmem [resolvable:$true] %s22_s13 }
   0x5   :  { %p142_p1 = scmp.lt.u32.totalorder %s138_s16, %s308_s0 }
   0x7   :  { %p144_p2 = pnand %p142_p1, %p139_p0 }
   0x9   :  { %147 = shalt.err (!%p144_p2)
}
   0xa   :  { %s148_s21 = scalar_lea.vmem %s23_s13, 256  ;;  %p153_p4 = scmp.lt.s32.totalorder %s23_s13, %s23_s13 }
   0xb   :  { %p149_p3 = scmp.ne.s32.totalorder %s23_s13, %s148_s21  ;;  %p154_p5 = scmp.lt.s32.totalorder %s148_s21, %s148_s21 }
   0xd   :  { %p155_p6 = por %p154_p5, %p153_p4 }
   0xf   :  { %p156_p7 = pnand %p155_p6, %p149_p3 }
  0x11   :  { %159 = shalt.err (!%p156_p7)
}
  0x12   :  { %s235_s22 = smov 128   ;;  %s236_s23 = smov 8  }
  0x13   :  { %28 = dma.hbm_to_vmem [thread:$0]  %s308_s0, 256, %s23_s13, [#allocation5], %s235_s22, %s235_s22, %s236_s23  }
  0x14   :  { %s237_s26 = smov [#allocation7]   ;;  %s160_s30 = scalar_lea.hbm %s309_s1, 256 }
  0x15   :  { %s38_s27 = sshll.u32 %s237_s26, 4  ;;  %p161_p8 = scmp.ne.s32.totalorder %s309_s1, %s160_s30  ;;  %s39_s27 = int_to_ptr.vmem [resolvable:$true] %s38_s27 }
  0x16   :  { %p164_p9 = scmp.lt.u32.totalorder %s160_s30, %s309_s1 }
  0x18   :  { %p166_p10 = pnand %p164_p9, %p161_p8 }
  0x1a   :  { %169 = shalt.err (!%p166_p10)
}
  0x1b   :  { %s170_s8 = scalar_lea.vmem %s39_s27, 256  ;;  %p175_p12 = scmp.lt.s32.totalorder %s39_s27, %s39_s27 }
  0x1c   :  { %p171_p11 = scmp.ne.s32.totalorder %s39_s27, %s170_s8  ;;  %p176_p13 = scmp.lt.s32.totalorder %s170_s8, %s170_s8 }
  0x1e   :  { %p177_p0 = por %p176_p13, %p175_p12 }
  0x20   :  { %p178_p1 = pnand %p177_p0, %p171_p11 }
  0x22   :  { %181 = shalt.err (!%p178_p1)
}
  0x23   :  { %44 = dma.hbm_to_vmem [thread:$0]  %s309_s1, 256, %s39_s27, [#allocation8], %s235_s22, %s235_s22, %s236_s23  }
  0x24   :  { %226 = dma.done.wait [#allocation5], 256  }
  0x25   :  { %227 = vsyncadd [#allocation5], 4294967040 }
  0x26   :  { %228 = dma.done.wait [#allocation8], 256  }
  0x27   :  { %229 = vsyncadd [#allocation8], 4294967040  ;;  %v61_v0 = vld [vmem:[#allocation4] sm:$0xff]  ;;  %v62_v1 = vld [vmem:[#allocation4 + $0x8] sm:$0xff]  ;;  %s238_s10 = smov [#allocation9]  }
  0x28   :  { %v63_v2 = vld [vmem:[#allocation7] sm:$0xff]  ;;  %v64_v3 = vld [vmem:[#allocation7 + $0x8] sm:$0xff]  ;;  %130 = vrcp.f32 %v61_v0  ;;  %s100_s11 = sshll.u32 %s238_s10, 4  ;;  %s101_s11 = int_to_ptr.vmem [resolvable:$true] %s100_s11 }
  0x29   :  { %v65_v4 = vsub.f32 %v61_v0, %v63_v2  ;;  %v66_v5 = vsub.f32 %v62_v1, %v64_v3  ;;  %132 = vrcp.f32 %v62_v1  ;;  %s182_s1 = scalar_lea.vmem %s101_s11, 128  ;;  %p187_p3 = scmp.lt.s32.totalorder %s101_s11, %s101_s11 }
  0x2a   :  { %134 = vlog2.f32 %v61_v0  ;;  %p183_p2 = scmp.ne.s32.totalorder %s101_s11, %s182_s1  ;;  %p188_p4 = scmp.lt.s32.totalorder %s182_s1, %s182_s1 }
  0x2b   :  { %v77_v6 = vmul.f32 %v65_v4, %v65_v4  ;;  %v78_v7 = vmul.f32 %v66_v5, %v66_v5  ;;  %136 = vlog2.f32 %v62_v1 }
  0x2c   :  { %p189_p5 = por %p188_p4, %p187_p3 }
  0x2d   :  { %v80_v8 = vadd.f32 %v78_v7, %v77_v6 }
  0x2e   :  { %p190_p6 = pnand %p189_p5, %p183_p2 }
  0x2f   :  { %91 = vst [vmem:[#allocation9] sm:$0xff] %v80_v8 }
  0x30   :  { %193 = shalt.err (!%p190_p6)
}
  0x31   :  { %s194_s14 = scalar_lea.hbm %s310_s2, 128 }
  0x32   :  { %p195_p7 = scmp.ne.s32.totalorder %s310_s2, %s194_s14  ;;  %p198_p8 = scmp.lt.u32.totalorder %s194_s14, %s310_s2 }
  0x34   :  { %p200_p9 = pnand %p198_p8, %p195_p7 }
  0x36   :  { %203 = shalt.err (!%p200_p9)
}
  0x37   :  { %103 = dma.vmem_to_hbm [thread:$0]  %s101_s11, 128, %s310_s2, [#allocation6]   ;;  %v131_v9 = vpop.eup %130 }
  0x38   :  { %v133_v10 = vpop.eup %132  ;;  %v69_v11 = vmul.f32 %v131_v9, %v63_v2  ;;  %s239_s21 = smov [#allocation10]  }
  0x39   :  { %v135_v12 = vpop.eup %134  ;;  %v70_v13 = vmul.f32 %v133_v10, %v64_v3  ;;  %s110_s22 = sshll.u32 %s239_s21, 4  ;;  %s111_s22 = int_to_ptr.vmem [resolvable:$true] %s110_s22 }
  0x3a   :  { %v137_v14 = vpop.eup %136  ;;  %v72_v15 = vmul.f32 0.6931472, %v135_v12  ;;  %s204_s23 = scalar_lea.vmem %s111_s22, 128  ;;  %p209_p11 = scmp.lt.s32.totalorder %s111_s22, %s111_s22 }
  0x3b   :  { %v74_v16 = vmul.f32 0.6931472, %v137_v14  ;;  %p205_p10 = scmp.ne.s32.totalorder %s111_s22, %s204_s23  ;;  %p210_p12 = scmp.lt.s32.totalorder %s204_s23, %s204_s23 }
  0x3c   :  { %v75_v17 = vadd.f32 %v72_v15, %v69_v11 }
  0x3d   :  { %v76_v18 = vadd.f32 %v74_v16, %v70_v13  ;;  %p211_p13 = por %p210_p12, %p209_p11 }
  0x3f   :  { %v84_v19 = vadd.f32 %v76_v18, %v75_v17  ;;  %p212_p0 = pnand %p211_p13, %p205_p10 }
  0x41   :  { %93 = vst [vmem:[#allocation10] sm:$0xff] %v84_v19 }
  0x42   :  { %215 = shalt.err (!%p212_p0)
}
  0x43   :  { %s216_s25 = scalar_lea.hbm %s311_s3, 128 }
  0x44   :  { %p217_p1 = scmp.ne.s32.totalorder %s311_s3, %s216_s25  ;;  %p220_p2 = scmp.lt.u32.totalorder %s216_s25, %s311_s3 }
  0x46   :  { %p222_p3 = pnand %p220_p2, %p217_p1 }
  0x48   :  { %225 = shalt.err (!%p222_p3)
}
  0x49   :  { %113 = dma.vmem_to_hbm [thread:$0]  %s111_s22, 128, %s311_s3, [#allocation11]  }
  0x4a   :  { %230 = dma.done.wait [#allocation6], 128  }
  0x4b   :  { %231 = vsyncadd [#allocation6], 4294967168 }
  0x4c   :  { %232 = dma.done.wait [#allocation11], 128  }
  0x4d   :  { %233 = vsyncadd [#allocation11], 4294967168 }
  0x4e   :  { %120 = vsyncpa [#allocation5], 1 }
  0x4f   :  { %121 = vsyncpa [#allocation8], 1 }
  0x50   :  { %122 = vsyncpa [#allocation6], 1 }
  0x51   :  { %123 = vsyncpa [#allocation11], 1 }

</bundles_post_ra>
